<compile_context>
chip_gen: v5e
topology: v5e:2x2
jax: 0.10.0
libtpu: 0.0.40
codegen_flags: <defaults>
</compile_context>

<pallas_src>
import functools

import jax
import jax.numpy as jnp
from jax.experimental import pallas as pl
from jax.experimental.pallas import tpu as pltpu


def _round_up(x, m):
    return (x + m - 1) // m * m


# --------------------------- kernels ---------------------------

def _linear_kernel(x_ref, w_ref, b_ref, o_ref):
    # x: (tile_n, F) bf16, w: (F, B) bf16 (resident), b: (1, B) f32
    y = jnp.dot(x_ref[...], w_ref[...], preferred_element_type=jnp.float32)
    o_ref[...] = (y + b_ref[...]).astype(o_ref.dtype)


def _linear_bn_dropout_kernel(x_ref, w_ref, b_ref, gamma_ref, beta_ref, mask_ref,
                              o_ref, *, training: bool):
    y = jnp.dot(x_ref[...], w_ref[...], preferred_element_type=jnp.float32)
    y = y + b_ref[...]

    # BatchNorm1d, training-mode batch statistics (biased variance).
    # var = E[y^2] - mean^2 : both reductions go back-to-back through the XLU,
    # no serialized reduce -> broadcast-subtract -> reduce chain.
    mean = jnp.mean(y, axis=0, keepdims=True)
    mean_sq = jnp.mean(y * y, axis=0, keepdims=True)
    var = mean_sq - mean * mean
    y = (y - mean) * jax.lax.rsqrt(var + 1e-5)
    y = y * gamma_ref[...] + beta_ref[...]
    # TODO(synk): no running-mean/var tracking, so BatchNorm1d.eval() semantics are
    # not reproduced (training-mode batch statistics only, matching module training).

    if training:
        # mask holds {0.0, 2.0} (inverted dropout, p=0.5), generated in the wrapper
        # from a JAX PRNG key (cannot match torch's RNG bit-for-bit).
        y = y * mask_ref[...]

    o_ref[...] = y.astype(o_ref.dtype)


# --------------------------- wrapper ---------------------------

def feat_bottleneck_forward(x, w_fb, b, gamma, beta, dropout_key,
                            *, bn_type="ori", training=True, tile_n=256):
    """
    x:     [N, F]  (cast to bf16 for the MXU)
    w_fb:  [F, B]  weight stored persistently in x@W layout (bf16)
    b, gamma, beta: [B] f32
    dropout_key: jax PRNG key for the Dropout(p=0.5) mask ('bn' path, training)
    """
    N, F = x.shape
    B = w_fb.shape[1]

    x = x.astype(jnp.bfloat16)
    w_fb = w_fb.astype(jnp.bfloat16)
    b2 = b.reshape(1, B).astype(jnp.float32)

    cost = pl.CostEstimate(
        flops=2 * N * F * B,
        transcendentals=0,
        bytes_accessed=2 * (N * F + F * B) + 4 * N * B,
    )

    if bn_type != "bn":
        # ---- Linear only: grid over the batch, weight block stays resident ----
        tn = min(tile_n, _round_up(N, 8))
        tn = _round_up(tn, 8)
        n_pad = _round_up(N, tn)
        if n_pad != N:
            x = jnp.pad(x, ((0, n_pad - N), (0, 0)))
        grid = (n_pad // tn,)

        # VMEM budget: double-buffered x (bf16) + out (f32), resident bf16 weight, bias.
        need = 2 * (tn * F * 2 + tn * B * 4) + 2 * F * B * 2 + 2 * B * 4
        vmem_limit = min(max(2 * need, 16 * 1024 * 1024), 40 * 1024 * 1024)

        out = pl.pallas_call(
            _linear_kernel,
            out_shape=jax.ShapeDtypeStruct((n_pad, B), jnp.float32),
            grid=grid,
            in_specs=[
                pl.BlockSpec((tn, F), lambda i: (i, 0)),   # x tile (pipelined)
                pl.BlockSpec((F, B), lambda i: (0, 0)),    # weight (resident)
                pl.BlockSpec((1, B), lambda i: (0, 0)),    # bias (lane-dense)
            ],
            out_specs=pl.BlockSpec((tn, B), lambda i: (i, 0)),
            compiler_params=pltpu.CompilerParams(
                dimension_semantics=("parallel",),
                vmem_limit_bytes=vmem_limit,
            ),
            cost_estimate=cost,
        )(x, w_fb, b2)
        return out[:N]

    # ---- 'bn' path: BatchNorm needs full-batch statistics -> single block.
    # SHOT batch sizes are small; tiling here would silently give per-tile stats.
    gamma2 = gamma.reshape(1, B).astype(jnp.float32)
    beta2 = beta.reshape(1, B).astype(jnp.float32)
    if training:
        keep = jax.random.bernoulli(dropout_key, 0.5, (N, B))
        mask = keep.astype(jnp.float32) * 2.0       # inverted-dropout scaling
    else:
        mask = jnp.ones((N, B), jnp.float32)

    kernel = functools.partial(_linear_bn_dropout_kernel, training=training)
    vmem = pl.BlockSpec(memory_space=pltpu.MemorySpace.VMEM)
    return pl.pallas_call(
        kernel,
        out_shape=jax.ShapeDtypeStruct((N, B), jnp.float32),
        in_specs=[vmem, vmem, vmem, vmem, vmem, vmem],
        out_specs=vmem,
        compiler_params=pltpu.CompilerParams(vmem_limit_bytes=40 * 1024 * 1024),
        cost_estimate=cost,
    )(x, w_fb, b2, gamma2, beta2, mask)


def init_params(key, feature_dim, bottleneck_dim):
    """Deterministic init matching `init_weights` in the reference module."""
    k_w, k_g = jax.random.split(key)
    # nn.init.xavier_normal_(Linear.weight): std = sqrt(2 / (fan_in + fan_out))
    std = (2.0 / (feature_dim + bottleneck_dim)) ** 0.5
    # stored persistently in [F, B] layout (x @ W), bf16 in HBM for the MXU / half the DMA
    w_fb = (std * jax.random.normal(k_w, (feature_dim, bottleneck_dim),
                                    jnp.float32)).astype(jnp.bfloat16)
    b = jnp.zeros((bottleneck_dim,), jnp.float32)
    gamma = 1.0 + 0.02 * jax.random.normal(k_g, (bottleneck_dim,), jnp.float32)
    beta = jnp.zeros((bottleneck_dim,), jnp.float32)
    return w_fb, b, gamma, beta


if __name__ == "__main__":
    key = jax.random.PRNGKey(0)
    k_x, k_p, k_d = jax.random.split(key, 3)

    N, feature_dim, bottleneck_dim = 16, 64, 256
    x = jax.random.normal(k_x, (N, feature_dim), jnp.float32)
    w_fb, b, gamma, beta = init_params(k_p, feature_dim, bottleneck_dim)

    # type='ori' (module default): just the Linear layer; tile_n=8 -> 2-step batch grid here
    y_ori = feat_bottleneck_forward(x, w_fb, b, gamma, beta, k_d,
                                    bn_type="ori", training=True, tile_n=8)
    jax.block_until_ready(y_ori)

    y_ref = jnp.dot(x.astype(jnp.bfloat16), w_fb,
                    preferred_element_type=jnp.float32) + b.reshape(1, -1)
    assert y_ori.shape == (N, bottleneck_dim)
    assert jnp.allclose(y_ori, y_ref, atol=1e-2, rtol=1e-2)

    # type='bn': Linear -> BatchNorm1d (batch stats) -> Dropout(0.5)
    y_bn = feat_bottleneck_forward(x, w_fb, b, gamma, beta, k_d,
                                   bn_type="bn", training=True)
    jax.block_until_ready(y_bn)
    assert y_bn.shape == (N, bottleneck_dim)
    assert bool(jnp.isfinite(y_bn).all())

    print("KERNEL_OK")
</pallas_src>

<mosaic_0001>
module attributes {stable_mosaic.version = 11 : i64} {
  func.func @_linear_kernel(%arg0: i32, %arg1: memref<8x64xbf16, #tpu.memory_space<vmem>>, %arg2: memref<64x256xbf16, #tpu.memory_space<vmem>>, %arg3: memref<1x256xf32, #tpu.memory_space<vmem>>, %arg4: memref<8x256xf32, #tpu.memory_space<vmem>>) attributes {dimension_semantics = [#tpu.dimension_semantics<parallel>], iteration_bounds = array<i64: 2>, scalar_prefetch = 0 : i64, scratch_operands = 0 : i64, tpu.core_type = #tpu.core_type<tc>, window_params = [{transform_indices = @transform_0, window_bounds = array<i64: 8, 64>}, {pipeline_mode = #tpu.pipeline_mode<synchronous>, transform_indices = @transform_1, window_bounds = array<i64: 64, 256>}, {pipeline_mode = #tpu.pipeline_mode<synchronous>, transform_indices = @transform_2, window_bounds = array<i64: 1, 256>}, {transform_indices = @transform_3, window_bounds = array<i64: 8, 256>}]} {
    %c0 = arith.constant 0 : index
    %c0_0 = arith.constant 0 : index
    %0 = vector.load %arg1[%c0, %c0_0] : memref<8x64xbf16, #tpu.memory_space<vmem>>, vector<8x64xbf16>
    %c0_1 = arith.constant 0 : index
    %c0_2 = arith.constant 0 : index
    %1 = vector.load %arg2[%c0_1, %c0_2] : memref<64x256xbf16, #tpu.memory_space<vmem>>, vector<64x256xbf16>
    %cst = arith.constant dense<0.000000e+00> : vector<8x256xf32>
    %2 = tpu.matmul %0, %1, %cst {dimension_numbers = #tpu.dot_dimension_numbers<[1], [0], [0], [1], [0, 0, 1, 1], [], []>} : vector<8x64xbf16>, vector<64x256xbf16>, vector<8x256xf32> -> vector<8x256xf32>
    %c0_3 = arith.constant 0 : index
    %c0_4 = arith.constant 0 : index
    %3 = vector.load %arg3[%c0_3, %c0_4] : memref<1x256xf32, #tpu.memory_space<vmem>>, vector<1x256xf32>
    %4 = vector.broadcast %3 : vector<1x256xf32> to vector<8x256xf32>
    %5 = arith.addf %2, %4 : vector<8x256xf32>
    %c0_5 = arith.constant 0 : index
    %c0_6 = arith.constant 0 : index
    %6 = vector.load %arg4[%c0_5, %c0_6] : memref<8x256xf32, #tpu.memory_space<vmem>>, vector<8x256xf32>
    tpu.vector_store %arg4[%c0_5, %c0_6], %5 {strides = array<i32>} : memref<8x256xf32, #tpu.memory_space<vmem>>, vector<8x256xf32>,
    return
  }
  func.func @transform_0(%arg0: i32) -> (i32, i32) {
    %c0_i32 = arith.constant 0 : i32
    %c0_i32_0 = arith.constant 0 : i32
    return %arg0, %c0_i32 : i32, i32
  }
  func.func @transform_1(%arg0: i32) -> (i32, i32) {
    %c0_i32 = arith.constant 0 : i32
    %c0_i32_0 = arith.constant 0 : i32
    %c0_i32_1 = arith.constant 0 : i32
    return %c0_i32, %c0_i32_0 : i32, i32
  }
  func.func @transform_2(%arg0: i32) -> (i32, i32) {
    %c0_i32 = arith.constant 0 : i32
    %c0_i32_0 = arith.constant 0 : i32
    %c0_i32_1 = arith.constant 0 : i32
    return %c0_i32, %c0_i32_0 : i32, i32
  }
  func.func @transform_3(%arg0: i32) -> (i32, i32) {
    %c0_i32 = arith.constant 0 : i32
    %c0_i32_0 = arith.constant 0 : i32
    return %arg0, %c0_i32 : i32, i32
  }
}

</mosaic_0001>

<bundles_post_ra>
// kernel: tpu_custom_call.1
= control target key start
LH: loop header
LB: loop body
LE: loop exit
PB: predicated region body
PF: predicated region fallthrough
CT: control target
= control target key end

     0   :  { %8 = vsyncpa [#allocation3], 0  ;;  %s877_s0 = inlined_call_operand.hbm [shape: bf16[16,64], index: 0, kind: input, shape index: {}]   ;;  %s878_s1 = inlined_call_operand.hbm [shape: bf16[64,256], index: 1, kind: input, shape index: {}]   ;;  %s879_s2 = inlined_call_operand.hbm [shape: f32[1,256], index: 2, kind: input, shape index: {}]   ;;  %s880_s3 = inlined_call_operand.hbm [shape: f32[16,256], index: 3, kind: output, shape index: {}]  }
   0x1   :  { %10 = vsyncpa [#allocation3 + $0x1], 0 }
   0x2   :  { %11 = vsyncpa [#allocation6], 0 }
   0x3   :  { %12 = vsyncpa [#allocation4], 0 }
   0x4   :  { %14 = vsyncpa [#allocation4 + $0x1], 0  ;;  %s728_s12 = smov 0   ;;  %s730_s13 = smov 0  }
   0x5   :  { %s732_s14 = smov 0   ;;  %s734_s15 = smov 0  }
   0x6 LB: > { %s130_s18 = sshll.u32 %s878_s1, 4  ;;  %s752_s19 = sadd.s32 4294967295, %s702_s15   ;;  %s702_s15 = sphi %s734_s15, %s891_s15   ;;  %s698_s14 = sphi %s732_s14, %s890_s14   ;;  %s694_s13 = sphi %s730_s13, %s889_s13   ;;  %s690_s12 = sphi %s728_s12, %s888_s12   ;;  %s131_s18 = int_to_ptr.hbm [resolvable:$true] %s130_s18 }
   0x7   : > { %p414_p0 = scmp.ge.s32.totalorder %s702_s15, 1  ;;  %p41_p1 = scmp.eq.s32.totalorder %s752_s19, 0 }
   0x8   : > { %p119_p2 = scmp.lt.s32.totalorder %s702_s15, 3  ;;  %s704_s21 = smov [#allocation5]  }
   0x9   : > { %s132_s22 = sshll.u32 %s704_s21, 4  ;;  %s145_s25 = sshll.u32 %s879_s2, 4  ;;  %s133_s22 = int_to_ptr.vmem [resolvable:$true] %s132_s22  ;;  %s146_s25 = int_to_ptr.hbm [resolvable:$true] %s145_s25 }
   0xa   : > { %p757_p3 = pnand %p414_p0, %p119_p2  ;;  %s705_s26 = smov [#allocation7]  }
   0xb   : > { %s147_s27 = sshll.u32 %s705_s26, 4  ;;  %s706_s28 = smov 128   ;;  %s148_s27 = int_to_ptr.vmem [resolvable:$true] %s147_s27 }
   0xc   : > { %p485_p4 = pneg %p757_p3  ;;  %s707_s29 = smov 8  }
   0xd   : > { %s413_s30 = sadd.s32 4294967294, %s702_s15   ;;  %s771_s4 = sadd.s32 1, %s702_s15  }
   0xe   : > { %p486_p6 = pnand %p485_p4, %p41_p1  ;;  %s24_s5 = ssub.s32 %s702_s15, %s771_s4 }
   0xf   : > { %s27_s6 = sadd.s32 1, %s698_s14  ;;  %p25_p7 = scmp.eq.s32.totalorder %s24_s5, 0 }
  0x10   : > { %488 = dma.hbm_to_vmem [thread:$0]  (!%p486_p6), %s131_s18, 1024, %s133_s22, [#allocation6], %s706_s28, %s706_s28, %s707_s29  }
  0x11   : > { %491 = dma.hbm_to_vmem [thread:$0]  (!%p486_p6), %s146_s25, 32, %s148_s27, [#allocation6]  }
  0x12   : > { %p34_p8 = scmp.ne.s32.totalorder %s698_s14, %s694_s13  ;;  %p35_p9 = scmp.eq.s32.totalorder %s702_s15, 0 }
  0x13   : > { %p40_p10 = scmp.ne.s32.totalorder %s694_s13, %s690_s12  ;;  %p106_p13 = scmp.eq.s32.totalorder %s752_s19, 1 }
  0x14   : > { %s782_s7 = scalar_select %p25_p7, %s698_s14, %s27_s6  }
  0x15   : > { %p784_p11 = por %p35_p9, %p34_p8  ;;  %p790_p12 = por %p41_p1, %p40_p10 }
  0x16   : > { %p112_p0 = scmp.eq.s32.totalorder %s413_s30, 1  ;;  %p502_p2 = scmp.lt.s32.totalorder %s702_s15, 2 }
  0x17   : > { %s158_s10 = sand.u32 1, %s698_s14   ;;  %p797_p4 = por %p106_p13, %p34_p8 }
  0x18   : > { %p801_p6 = por %p112_p0, %p40_p10  ;;  %s418_s17 = sshll.u32 %s158_s10, 2 }
  0x19   : > { %s419_s18 = sshll.u32 %s702_s15, 2  ;;  %s162_s24 = scalar_lea.vmem [#allocation2], %s418_s17 }
  0x1a   : > { %s166_s23 = scalar_lea.hbm %s877_s0, %s419_s18  ;;  %s170_s25 = sshll.u32 %s162_s24, 4  ;;  %s171_s25 = int_to_ptr.vmem [resolvable:$true] %s170_s25 }
  0x1b   : > { %s168_s26 = sshll.u32 %s166_s23, 4  ;;  %p811_p7 = pnand %p502_p2, %p784_p11  ;;  %s169_s26 = int_to_ptr.hbm [resolvable:$true] %s168_s26 }
  0x1c   : > { %s159_s28 = scalar_lea.sflag [#allocation3], %s158_s10  ;;  %s602_s29 = sshra.s32 %s169_s26, 4  ;;  %s603_s29 = int_to_ptr.hbm [resolvable:$true] %s602_s29 }
  0x1d   : > { %s604_s30 = scalar_lea.hbm %s603_s29, 4  ;;  %p606_p9 = pneg %p811_p7 }
  0x1e   : > { %p605_p8 = scmp.ne.s32.totalorder %s603_s29, %s604_s30  ;;  %s609_s17 = scalar_lea.hbm %s877_s0, 8 }
  0x1f   : > { %p610_p11 = scmp.lt.s32.totalorder %s603_s29, %s877_s0  ;;  %p611_p0 = scmp.lt.s32.totalorder %s609_s17, %s604_s30 }
  0x20   : > { %p607_p10 = pnand %p606_p9, %p605_p8 }
  0x21   : > { %p612_p2 = por %p611_p0, %p610_p11 }
  0x22   : > { %p608_p13 = pneg %p607_p10 }
  0x24   : > { %p613_p5 = pnand %p612_p2, %p608_p13 }
  0x26   : > { %616 = shalt.err (!%p613_p5)
}
  0x27   : > { %495 = dma.hbm_to_vmem [thread:$0]  (!%p811_p7), %s169_s26, 64, %s171_s25, %s159_s28  }
  0x28   : > { %179 = sbr.rel (%p757_p3) target bundleno = 201 (0xc9), region = 32  ;;  %s828_s10 = sand.u32 (!%p757_p3), 1, %s694_s13  }
  0x29   : > { %s421_s21 = sshll.u32 (!%p757_p3), %s828_s10, 2  ;;  %s182_s22 = scalar_lea.sflag (!%p757_p3), [#allocation3], %s828_s10 }
  0x2a   : > { %s832_s23 = scalar_lea.vmem (!%p757_p3), [#allocation2], %s421_s21 }
  0x2d   : > { %677 = dma.done.wait (%p790_p12), %s182_s22, 64  }
  0x2e   : > { %679 = vsyncadd (%p790_p12), %s182_s22, 4294967232 }
  0x2f   : > { %681 = dma.done.wait (%p41_p1), [#allocation6], 1056  }
  0x30   : > { %683 = vsyncadd (%p41_p1), [#allocation6], 4294966240  ;;  %v451_v0 = vld [vmem:[#allocation5 + $0x30] sm:$0xf]  ;;  %v471_v1 = vld [vmem:[#allocation5 + $0x34] sm:$0xf0] }
  0x31   : > { %v470_v2 = vld [vmem:[#allocation5 + $0x34] sm:$0xf]  ;;  %v452_v3 = vor.u32 %v471_v1, %v451_v0  ;;  %v453_v4 = vld [vmem:[#allocation5 + $0x38] sm:$0xf0]  ;;  %v443_v5 = vld [vmem:[#allocation5 + $0x20] sm:$0xf] }
  0x32   : > { %v469_v6 = vld [vmem:[#allocation5 + $0x24] sm:$0xf0]  ;;  %v456_v7 = vor.u32 %v470_v2, %v453_v4  ;;  %v468_v8 = vld [vmem:[#allocation5 + $0x24] sm:$0xf]  ;;  %v445_v9 = vld [vmem:[#allocation5 + $0x28] sm:$0xf0] }
  0x33   : > { %283 = vmatpush.bf16.msra.mxu0 %v452_v3  ;;  %v444_v10 = vor.u32 %v469_v6, %v443_v5  ;;  %v448_v11 = vor.u32 %v468_v8, %v445_v9  ;;  %v435_v12 = vld [vmem:[#allocation5 + $0x10] sm:$0xf]  ;;  %v467_v13 = vld [vmem:[#allocation5 + $0x14] sm:$0xf0]  ;;  %v466_v14 = vld [vmem:[#allocation5 + $0x14] sm:$0xf] }
  0x34   : > { %296 = vmatpush.bf16.msra.mxu1 %v456_v7  ;;  %v437_v15 = vld [vmem:[#allocation5 + $0x18] sm:$0xf0]  ;;  %v436_v16 = vor.u32 %v467_v13, %v435_v12  ;;  %v427_v18 = vld [vmem:[#allocation5] sm:$0xf]  ;;  %v465_v19 = vld [vmem:[#allocation5 + $0x4] sm:$0xf0] }
  0x35   : > { %v440_v17 = vor.u32 %v466_v14, %v437_v15  ;;  %v464_v20 = vld [vmem:[#allocation5 + $0x4] sm:$0xf]  ;;  %v429_v21 = vld [vmem:[#allocation5 + $0x8] sm:$0xf0]  ;;  %v428_v22 = vor.u32 %v465_v19, %v427_v18  ;;  %v220_v24 = vld [vmem:[%s832_s23] sm:$0xf] }
  0x36   : > { %v432_v23 = vor.u32 %v464_v20, %v429_v21  ;;  %vm275_vm0 = vcmask 523264   ;;  %s472_s20 = sshll.u32 %s752_s19, 4  ;;  %v229_v25 = vld [vmem:[#allocation7] sm:$0x3]  ;;  %s424_s9 = sshll.u32 %s828_s10, 4 }
  0x37   : > { %284 = vmatpush.bf16.msra.mxu0 %v444_v10  ;;  %s319_s26 = scalar_lea.hbm %s880_s3, %s472_s20  ;;  %v231_v26 = vperm.slane %v229_v25, 0  ;;  %v232_v27 = vperm.slane %v229_v25, 1  ;;  %s218_s27 = scalar_lea.vmem [#allocation8], %s424_s9 }
  0x38   : > { %297 = vmatpush.bf16.msra.mxu1 %v448_v11  ;;  %s321_s28 = sshll.u32 %s218_s27, 4  ;;  %s323_s29 = sshll.u32 %s319_s26, 4  ;;  %s322_s28 = int_to_ptr.vmem [resolvable:$true] %s321_s28  ;;  %s324_s29 = int_to_ptr.hbm [resolvable:$true] %s323_s29 }
  0x39   : > { %s308_s19 = scalar_lea.sflag [#allocation4], %s828_s10  ;;  %s646_s30 = sshra.s32 %s324_s29, 4  ;;  %s647_s30 = int_to_ptr.hbm [resolvable:$true] %s646_s30 }
  0x3a   : > { %s648_s5 = scalar_lea.hbm %s647_s30, 16  ;;  %s652_s18 = scalar_lea.hbm %s880_s3, 32 }
  0x3b   : > { %285 = vmatpush.bf16.msra.mxu0 %v436_v16  ;;  %p649_p1 = scmp.ne.s32.totalorder %s647_s30, %s648_s5  ;;  %p653_p12 = scmp.lt.s32.totalorder %s647_s30, %s880_s3 }
  0x3c   : > { %298 = vmatpush.bf16.msra.mxu1 %v440_v17  ;;  %p654_p7 = scmp.lt.s32.totalorder %s652_s18, %s648_s5 }
  0x3d   : > { %p650_p3 = pnand %p649_p1, %p797_p4 }
  0x3e   : > { %p655_p8 = por %p654_p7, %p653_p12 }
  0x3f   : > { %286 = vmatpush.bf16.msra.mxu0 %v428_v22  ;;  %p651_p5 = pneg %p650_p3 }
  0x40   : > { %299 = vmatpush.bf16.msra.mxu1 %v432_v23 }
  0x41   : > { %p656_p9 = pnand %p655_p8, %p651_p5 }
  0x42   : > { %457 = vmatmul.msk.bf16.vlgmr.msra.gmra.mxu0 %vm275_vm0, %v220_v24 }
  0x43   : > { %458 = vmatmul.msk.bf16.vlgmr.msra.gmra.mxu1 %vm275_vm0, %v220_v24 }
  0xbf   : > { %v288_v28 = vpop.f32.mrf.mxu0 }
  0xc0   : > { %v289_v29 = vadd.f32 %v288_v28, %v231_v26  ;;  %v301_v30 = vpop.f32.mrf.mxu1 }
  0xc1   : > { %v302_v31 = vadd.f32 %v301_v30, %v232_v27 }
  0xc2   : > { %305 = vst [vmem:[%s218_s27] sm:$0xff] %v289_v29 }
  0xc3   : > { %306 = vst [vmem:[%s218_s27 + $0x8] sm:$0xff] %v302_v31 }
  0xc4   : > { %659 = shalt.err (!%p656_p9)
}
  0xc5   : > { %483 = dma.vmem_to_hbm [thread:$0]  (%p797_p4), %s322_s28, 256, %s324_s29, %s308_s19  }
  0xc7   : > { %v290_v32 = vpop.f32.mrf.mxu0 }
  0xc8   : > { %v303_v33 = vpop.f32.mrf.mxu1 }
  0xc9 PF: > { %s335_s10 = sand.u32 1, %s690_s12   ;;  %p887_p10 = scmp.ge.s32.totalorder %s702_s15, 2 }
  0xca   : > { %s336_s22 = scalar_lea.sflag [#allocation4], %s335_s10 }
  0xcb   : > { %p497_p13 = pnand %p887_p10, %p801_p6 }
  0xcd   : > { %p498_p11 = pneg %p497_p13 }
  0xcf   : > { %685 = dma.done.wait (%p498_p11), %s336_s22, 256  }
  0xd0   : > { %687 = vsyncadd (%p498_p11), %s336_s22, 4294967040  ;;  %p17_p4 = scmp.ge.s32.totalorder %s771_s4, 4   ;;  %s888_s12 = smov %s694_s13 }
  0xd1   : > { %s889_s13 = smov %s698_s14  ;;  %s890_s14 = smov %s782_s7 }
  0xd2   : > { %s891_s15 = smov %s771_s4  ;;  %19 = sbr.rel (!%p17_p4) target bundleno = 6 (0x6), region = 85 }
  0xd7   :  { %342 = vsyncpa [#allocation3], 1 }
  0xd8   :  { %344 = vsyncpa [#allocation3 + $0x1], 1 }
  0xd9   :  { %345 = vsyncpa [#allocation6], 1 }
  0xda   :  { %346 = vsyncpa [#allocation4], 1 }
  0xdb   :  { %348 = vsyncpa [#allocation4 + $0x1], 1 }

</bundles_post_ra>
